<compile_context>
chip_gen: v7x
topology: tpu7x:2x2x1
jax: 0.10.0
libtpu: 0.0.40
codegen_flags: <defaults>
</compile_context>

<pallas_src>
import functools

import jax
import jax.numpy as jnp
from jax import lax
from jax.experimental import pallas as pl
from jax.experimental.pallas import tpu as pltpu


def _round_up(n, m):
    return ((n + m - 1) // m) * m


def ml_item_kernel(x_ref, w_mh_ref, w_oh_ref, out_ref, *, num_rate, emb_dim):
    """Fused ml_item forward for one batch tile.

    x_ref:    (TB, d_in) int32   raw input rows
    w_mh_ref: (d_in, 4E) f32     block-diagonal weight for multi-hot columns
    w_oh_ref: (nr+ny, 4E) f32    block-diagonal weight for rate/year one-hots
    out_ref:  (TB, 4E) f32
    """
    tb, d_in = x_ref.shape
    k_oh = w_oh_ref.shape[0]

    x = x_ref[...]                                     # (TB, d_in) int32
    rate_idx = x[:, 0:1]                               # (TB, 1)
    year_idx = x[:, 1:2]                               # (TB, 1)

    # Multi-hot activation: keep genre/director columns in place, zero the two
    # index columns (pure VPU select, no relayout).
    col = lax.broadcasted_iota(jnp.int32, (tb, d_in), 1)
    mh = jnp.where(col >= 2, x.astype(jnp.float32), 0.0)          # (TB, d_in)

    # Rate/year one-hots built in-kernel via iota compares.
    tcol = lax.broadcasted_iota(jnp.int32, (tb, k_oh), 1)
    oh = ((tcol == rate_idx).astype(jnp.float32)
          + (tcol == year_idx + num_rate).astype(jnp.float32))    # (TB, k_oh)

    # Two MXU passes, both with a lane-dense 4E-wide output, summed in f32.
    y = (jnp.dot(mh, w_mh_ref[...], preferred_element_type=jnp.float32)
         + jnp.dot(oh, w_oh_ref[...], preferred_element_type=jnp.float32))

    # Sigmoid only on the genre/director half (output cols >= 2E); single
    # dense 4E-lane store.
    ocol = lax.broadcasted_iota(jnp.int32, y.shape, 1)
    out_ref[...] = jnp.where(ocol >= 2 * emb_dim, jax.nn.sigmoid(y), y)


def build_fused_weights(params, config):
    """One-time weight assembly (hoisted out of the per-call path)."""
    E = config['embedding_dim']
    ng, nd = config['num_genre'], config['num_director']
    nr, ny = config['num_rate'], config['num_year']
    d_in = 2 + ng + nd

    w_mh = jnp.zeros((d_in, 4 * E), jnp.float32)
    w_mh = w_mh.at[2:2 + ng, 2 * E:3 * E].set(params['w_genre'].T)        # genre
    w_mh = w_mh.at[2 + ng:d_in, 3 * E:4 * E].set(params['w_director'].T)  # director

    w_oh = jnp.zeros((nr + ny, 4 * E), jnp.float32)
    w_oh = w_oh.at[0:nr, 0:E].set(params['emb_rate'])                     # rate
    w_oh = w_oh.at[nr:nr + ny, E:2 * E].set(params['emb_year'])           # year
    return w_mh, w_oh


def ml_item_forward(x, w_mh, w_oh, config, *, tb=1024):
    """x: int (B, 2+num_genre+num_director). Returns (B, 4*embedding_dim) f32."""
    E = config['embedding_dim']
    nr = config['num_rate']
    d_in = w_mh.shape[0]
    k_oh = w_oh.shape[0]

    x = x.astype(jnp.int32)
    B = x.shape[0]
    assert x.shape[1] == d_in, "input width must be 2 + num_genre + num_director"

    # Batch tiling: 8-row-aligned tiles up to `tb`; pad B so the grid is even.
    TB = min(tb, _round_up(B, 8))
    B_pad = _round_up(B, TB)
    if B_pad != B:
        x = jnp.pad(x, ((0, B_pad - B), (0, 0)))

    kernel = functools.partial(ml_item_kernel, num_rate=nr, emb_dim=E)

    out = pl.pallas_call(
        kernel,
        out_shape=jax.ShapeDtypeStruct((B_pad, 4 * E), jnp.float32),
        grid=(B_pad // TB,),
        in_specs=[
            pl.BlockSpec((TB, d_in), lambda i: (i, 0)),      # per-tile rows of x
            pl.BlockSpec((d_in, 4 * E), lambda i: (0, 0)),   # weights stay resident
            pl.BlockSpec((k_oh, 4 * E), lambda i: (0, 0)),
        ],
        out_specs=pl.BlockSpec((TB, 4 * E), lambda i: (i, 0)),
        compiler_params=pltpu.CompilerParams(
            dimension_semantics=("parallel",)),
    )(x, w_mh, w_oh)

    return out[:B] if B_pad != B else out


def make_params(key, config):
    """Deterministic synthetic parameters matching the PyTorch module shapes."""
    nr, ng = config['num_rate'], config['num_genre']
    nd, ny = config['num_director'], config['num_year']
    E = config['embedding_dim']

    k1, k2, k3, k4 = jax.random.split(key, 4)
    emb_rate = jax.random.normal(k1, (nr, E), dtype=jnp.float32)   # nn.Embedding: N(0,1)
    emb_year = jax.random.normal(k2, (ny, E), dtype=jnp.float32)
    bg = 1.0 / jnp.sqrt(jnp.float32(ng))
    bd = 1.0 / jnp.sqrt(jnp.float32(nd))
    w_genre = jax.random.uniform(k3, (E, ng), jnp.float32, -bg, bg)       # (out, in)
    w_director = jax.random.uniform(k4, (E, nd), jnp.float32, -bd, bd)
    return {'emb_rate': emb_rate, 'emb_year': emb_year,
            'w_genre': w_genre, 'w_director': w_director}


def reference_forward(x, params, config):
    """Pure-JAX reference mirroring the PyTorch forward."""
    ng = config['num_genre']
    rate_idx = x[:, 0]
    year_idx = x[:, 1]
    genre = x[:, 2:2 + ng].astype(jnp.float32)
    director = x[:, 2 + ng:].astype(jnp.float32)
    rate_emb = params['emb_rate'][rate_idx]
    year_emb = params['emb_year'][year_idx]
    genre_emb = jax.nn.sigmoid(genre @ params['w_genre'].T)
    director_emb = jax.nn.sigmoid(director @ params['w_director'].T)
    return jnp.concatenate([rate_emb, year_emb, genre_emb, director_emb], axis=1)


if __name__ == "__main__":
    config = {
        'num_rate': 6,
        'num_genre': 25,      # forward slices x[:, 2:27] -> 25 genre columns
        'num_director': 8,
        'num_year': 10,
        'embedding_dim': 32,
    }
    B = 8

    key = jax.random.PRNGKey(0)
    kp, kr, ky, kg, kd = jax.random.split(key, 5)

    params = make_params(kp, config)
    w_mh, w_oh = build_fused_weights(params, config)   # one-time fused weights

    rate_idx = jax.random.randint(kr, (B, 1), 0, config['num_rate'], dtype=jnp.int32)
    year_idx = jax.random.randint(ky, (B, 1), 0, config['num_year'], dtype=jnp.int32)
    genre_mh = jax.random.bernoulli(kg, 0.3, (B, config['num_genre'])).astype(jnp.int32)
    director_mh = jax.random.bernoulli(kd, 0.2, (B, config['num_director'])).astype(jnp.int32)
    x = jnp.concatenate([rate_idx, year_idx, genre_mh, director_mh], axis=1)  # (B, 35)

    out = ml_item_forward(x, w_mh, w_oh, config)
    out = jax.block_until_ready(out)

    ref = reference_forward(x, params, config)
    assert out.shape == (B, 4 * config['embedding_dim'])
    assert jnp.allclose(out, ref, atol=1e-5, rtol=1e-5)

    print("KERNEL_OK")
</pallas_src>

<mosaic_0001>
module attributes {stable_mosaic.version = 11 : i64} {
  func.func @ml_item_kernel(%arg0: i32, %arg1: memref<8x35xi32, #tpu.memory_space<vmem>>, %arg2: memref<35x128xf32, #tpu.memory_space<vmem>>, %arg3: memref<16x128xf32, #tpu.memory_space<vmem>>, %arg4: memref<8x128xf32, #tpu.memory_space<vmem>>) attributes {dimension_semantics = [#tpu.dimension_semantics<parallel>], iteration_bounds = array<i64: 1>, scalar_prefetch = 0 : i64, scratch_operands = 0 : i64, tpu.core_type = #tpu.core_type<tc>, window_params = [{transform_indices = @transform_0, window_bounds = array<i64: 8, 35>}, {pipeline_mode = #tpu.pipeline_mode<synchronous>, transform_indices = @transform_1, window_bounds = array<i64: 35, 128>}, {pipeline_mode = #tpu.pipeline_mode<synchronous>, transform_indices = @transform_2, window_bounds = array<i64: 16, 128>}, {transform_indices = @transform_3, window_bounds = array<i64: 8, 128>}]} {
    %c0 = arith.constant 0 : index
    %c0_0 = arith.constant 0 : index
    %0 = vector.load %arg1[%c0, %c0_0] : memref<8x35xi32, #tpu.memory_space<vmem>>, vector<8x35xi32>
    %1 = vector.extract_strided_slice %0 {offsets = [0, 0], sizes = [8, 1], strides = [1, 1]} : vector<8x35xi32> to vector<8x1xi32>
    %2 = vector.extract_strided_slice %0 {offsets = [0, 1], sizes = [8, 1], strides = [1, 1]} : vector<8x35xi32> to vector<8x1xi32>
    %3 = tpu.iota {dimensions = array<i32: 1>} : vector<8x35xi32>
    %c2_i32 = arith.constant 2 : i32
    %4 = vector.broadcast %c2_i32 : i32 to vector<8x35xi32>
    %5 = arith.cmpi sge, %3, %4 : vector<8x35xi32>
    %6 = arith.sitofp %0 : vector<8x35xi32> to vector<8x35xf32>
    %cst = arith.constant 0.000000e+00 : f32
    %7 = vector.broadcast %cst : f32 to vector<8x35xf32>
    %8 = arith.select %5, %6, %7 : vector<8x35xi1>, vector<8x35xf32>
    %9 = tpu.iota {dimensions = array<i32: 1>} : vector<8x16xi32>
    %10 = vector.broadcast %1 : vector<8x1xi32> to vector<8x16xi32>
    %11 = arith.cmpi eq, %9, %10 : vector<8x16xi32>
    %12 = arith.extui %11 : vector<8x16xi1> to vector<8x16xi32>
    %13 = arith.sitofp %12 : vector<8x16xi32> to vector<8x16xf32>
    %c6_i32 = arith.constant 6 : i32
    %14 = vector.broadcast %c6_i32 : i32 to vector<8x1xi32>
    %15 = arith.addi %2, %14 : vector<8x1xi32>
    %16 = vector.broadcast %15 : vector<8x1xi32> to vector<8x16xi32>
    %17 = arith.cmpi eq, %9, %16 : vector<8x16xi32>
    %18 = arith.extui %17 : vector<8x16xi1> to vector<8x16xi32>
    %19 = arith.sitofp %18 : vector<8x16xi32> to vector<8x16xf32>
    %20 = arith.addf %13, %19 : vector<8x16xf32>
    %c0_1 = arith.constant 0 : index
    %c0_2 = arith.constant 0 : index
    %21 = vector.load %arg2[%c0_1, %c0_2] : memref<35x128xf32, #tpu.memory_space<vmem>>, vector<35x128xf32>
    %cst_3 = arith.constant dense<0.000000e+00> : vector<8x128xf32>
    %22 = tpu.matmul %8, %21, %cst_3 {dimension_numbers = #tpu.dot_dimension_numbers<[1], [0], [0], [1], [0, 0, 1, 1], [], []>} : vector<8x35xf32>, vector<35x128xf32>, vector<8x128xf32> -> vector<8x128xf32>
    %c0_4 = arith.constant 0 : index
    %c0_5 = arith.constant 0 : index
    %23 = vector.load %arg3[%c0_4, %c0_5] : memref<16x128xf32, #tpu.memory_space<vmem>>, vector<16x128xf32>
    %cst_6 = arith.constant dense<0.000000e+00> : vector<8x128xf32>
    %24 = tpu.matmul %20, %23, %cst_6 {dimension_numbers = #tpu.dot_dimension_numbers<[1], [0], [0], [1], [0, 0, 1, 1], [], []>} : vector<8x16xf32>, vector<16x128xf32>, vector<8x128xf32> -> vector<8x128xf32>
    %25 = arith.addf %22, %24 : vector<8x128xf32>
    %26 = tpu.iota {dimensions = array<i32: 1>} : vector<8x128xi32>
    %c64_i32 = arith.constant 64 : i32
    %27 = vector.broadcast %c64_i32 : i32 to vector<8x128xi32>
    %28 = arith.cmpi sge, %26, %27 : vector<8x128xi32>
    %29 = arith.negf %25 : vector<8x128xf32>
    %30 = math.exp %29 : vector<8x128xf32>
    %cst_7 = arith.constant 1.000000e+00 : f32
    %31 = vector.broadcast %cst_7 : f32 to vector<8x128xf32>
    %32 = arith.addf %31, %30 : vector<8x128xf32>
    %33 = arith.divf %31, %32 : vector<8x128xf32>
    %34 = arith.select %28, %33, %25 : vector<8x128xi1>, vector<8x128xf32>
    %c0_8 = arith.constant 0 : index
    %c0_9 = arith.constant 0 : index
    %35 = vector.load %arg4[%c0_8, %c0_9] : memref<8x128xf32, #tpu.memory_space<vmem>>, vector<8x128xf32>
    tpu.vector_store %arg4[%c0_8, %c0_9], %34 {strides = array<i32>} : memref<8x128xf32, #tpu.memory_space<vmem>>, vector<8x128xf32>,
    return
  }
  func.func @transform_0(%arg0: i32) -> (i32, i32) {
    %c0_i32 = arith.constant 0 : i32
    %c0_i32_0 = arith.constant 0 : i32
    return %arg0, %c0_i32 : i32, i32
  }
  func.func @transform_1(%arg0: i32) -> (i32, i32) {
    %c0_i32 = arith.constant 0 : i32
    %c0_i32_0 = arith.constant 0 : i32
    %c0_i32_1 = arith.constant 0 : i32
    return %c0_i32, %c0_i32_0 : i32, i32
  }
  func.func @transform_2(%arg0: i32) -> (i32, i32) {
    %c0_i32 = arith.constant 0 : i32
    %c0_i32_0 = arith.constant 0 : i32
    %c0_i32_1 = arith.constant 0 : i32
    return %c0_i32, %c0_i32_0 : i32, i32
  }
  func.func @transform_3(%arg0: i32) -> (i32, i32) {
    %c0_i32 = arith.constant 0 : i32
    %c0_i32_0 = arith.constant 0 : i32
    return %arg0, %c0_i32 : i32, i32
  }
}

</mosaic_0001>

<bundles_post_ra>
// kernel: tpu_custom_call.1
= control target key start
LH: loop header
LB: loop body
LE: loop exit
PB: predicated region body
PF: predicated region fallthrough
CT: control target
= control target key end

     0   :  { %8 = vsyncpa [#allocation3], 0  ;;  %s499_s0 = inlined_call_operand.hbm [shape: s32[8,35], index: 0, kind: input, shape index: {}]   ;;  %s500_s1 = inlined_call_operand.hbm [shape: f32[35,128], index: 1, kind: input, shape index: {}]   ;;  %s501_s2 = inlined_call_operand.hbm [shape: f32[16,128], index: 2, kind: input, shape index: {}]   ;;  %s502_s3 = inlined_call_operand.hbm [shape: f32[8,128], index: 3, kind: output, shape index: {}]  }
   0x1   :  { %9 = vsyncpa [#allocation6], 0 }
   0x2   :  { %10 = vsyncpa [#allocation4], 0  ;;  %s414_s12 = smov [#allocation5]   ;;  %s320_s16 = scalar_lea.hbm %s500_s1, 640 }
   0x3   :  { %s26_s13 = sshll.u32 %s414_s12, 4  ;;  %p321_p0 = scmp.ne.s32.totalorder %s500_s1, %s320_s16  ;;  %s27_s13 = int_to_ptr.vmem [resolvable:$true] %s26_s13 }
   0x4   :  { %p324_p1 = scmp.lt.u32.totalorder %s320_s16, %s500_s1 }
   0x6   :  { %p326_p2 = pnand %p324_p1, %p321_p0 }
   0x8   :  { %329 = shalt.err (!%p326_p2)
}
   0x9   :  { %s330_s21 = scalar_lea.vmem %s27_s13, 640  ;;  %p335_p4 = scmp.lt.s32.totalorder %s27_s13, %s27_s13 }
   0xa   :  { %p331_p3 = scmp.ne.s32.totalorder %s27_s13, %s330_s21  ;;  %p336_p5 = scmp.lt.s32.totalorder %s330_s21, %s330_s21 }
   0xc   :  { %p337_p6 = por %p336_p5, %p335_p4 }
   0xe   :  { %p338_p7 = pnand %p337_p6, %p331_p3 }
  0x10   :  { %341 = shalt.err (!%p338_p7)
}
  0x11   :  { %s415_s22 = smov 128   ;;  %s416_s23 = smov 8  }
  0x12   :  { %32 = dma.hbm_to_vmem [thread:$0]  %s500_s1, 640, %s27_s13, [#allocation6], %s415_s22, %s415_s22, %s416_s23  }
  0x13   :  { %s417_s26 = smov [#allocation2]   ;;  %s418_s28 = smov [#allocation7]  }
  0x14   :  { %s17_s27 = sshll.u32 %s417_s26, 4  ;;  %s38_s29 = sshll.u32 %s418_s28, 4  ;;  %s18_s27 = int_to_ptr.vmem [resolvable:$true] %s17_s27  ;;  %s39_s29 = int_to_ptr.vmem [resolvable:$true] %s38_s29 }
  0x15   :  { %s342_s5 = scalar_lea.hbm %s499_s0, 128 }
  0x16   :  { %p343_p8 = scmp.ne.s32.totalorder %s499_s0, %s342_s5  ;;  %p346_p9 = scmp.lt.u32.totalorder %s342_s5, %s499_s0 }
  0x18   :  { %p348_p10 = pnand %p346_p9, %p343_p8 }
  0x1a   :  { %351 = shalt.err (!%p348_p10)
}
  0x1b   :  { %s352_s1 = scalar_lea.vmem %s18_s27, 128  ;;  %p357_p12 = scmp.lt.s32.totalorder %s18_s27, %s18_s27 }
  0x1c   :  { %p353_p11 = scmp.ne.s32.totalorder %s18_s27, %s352_s1  ;;  %p358_p13 = scmp.lt.s32.totalorder %s352_s1, %s352_s1 }
  0x1e   :  { %p359_p0 = por %p358_p13, %p357_p12 }
  0x20   :  { %p360_p1 = pnand %p359_p0, %p353_p11 }
  0x22   :  { %363 = shalt.err (!%p360_p1)
}
  0x23   :  { %20 = dma.hbm_to_vmem [thread:$0]  %s499_s0, 128, %s18_s27, [#allocation3]  }
  0x24   :  { %s364_s14 = scalar_lea.hbm %s501_s2, 256 }
  0x25   :  { %p365_p2 = scmp.ne.s32.totalorder %s501_s2, %s364_s14  ;;  %p368_p3 = scmp.lt.u32.totalorder %s364_s14, %s501_s2 }
  0x27   :  { %p370_p4 = pnand %p368_p3, %p365_p2 }
  0x29   :  { %373 = shalt.err (!%p370_p4)
}
  0x2a   :  { %s374_s19 = scalar_lea.vmem %s39_s29, 256  ;;  %p379_p6 = scmp.lt.s32.totalorder %s39_s29, %s39_s29 }
  0x2b   :  { %p375_p5 = scmp.ne.s32.totalorder %s39_s29, %s374_s19  ;;  %p380_p7 = scmp.lt.s32.totalorder %s374_s19, %s374_s19 }
  0x2d   :  { %p381_p8 = por %p380_p7, %p379_p6 }
  0x2f   :  { %p382_p9 = pnand %p381_p8, %p375_p5 }
  0x31   :  { %385 = shalt.err (!%p382_p9)
}
  0x32   :  { %44 = dma.hbm_to_vmem [thread:$0]  %s501_s2, 256, %s39_s29, [#allocation6], %s415_s22, %s415_s22, %s416_s23  }
  0x33   :  { %408 = dma.done.wait [#allocation3], 128  }
  0x34   :  { %409 = vsyncadd [#allocation3], 4294967168 }
  0x35   :  { %410 = dma.done.wait [#allocation6], 896  }
  0x36   :  { %411 = vsyncadd [#allocation6], 4294966400  ;;  %v419_v0 = vmov 0   ;;  %v420_v1 = vmov 0.0|0.0   ;;  %v54_v2 = vld [vmem:[#allocation2] sm:$0xff]  ;;  %v74_v3 = vld [vmem:[#allocation5] sm:$0xff]  ;;  %v55_v6 = vlaneseq }
  0x37   :  { %314 = vset.pattern.permute.xlu0 %v419_v0  ;;  %296 = vmatprep.subr.bf16.mxu0 %v420_v1  ;;  %v75_v4 = vld [vmem:[#allocation5 + $0x8] sm:$0xff]  ;;  %v76_v7 = vld [vmem:[#allocation5 + $0x10] sm:$0xff]  ;;  %v77_v8 = vld [vmem:[#allocation5 + $0x18] sm:$0xff]  ;;  %v66_v9 = vadd.s32 6, %v54_v2  ;;  %v58_v13 = vcvt.s32.f32 %v54_v2  ;;  %v421_v14 = vmov 1   ;;  %v422_v17 = vmov 0.0  }
  0x38   :  { %293 = vmatprep.subr.bf16.mxu1 %v420_v1  ;;  %61 = vperm.xlu0 %314, %v54_v2   ;;  %v297_v5 = vpack.c.bf16 %v75_v4, %v74_v3  ;;  %v300_v10 = vpack.c.bf16 %v77_v8, %v76_v7  ;;  %v79_v11 = vld [vmem:[#allocation7] sm:$0xff]  ;;  %v80_v12 = vld [vmem:[#allocation7 + $0x8] sm:$0xff]  ;;  %v56_v15 = vand.u32 127, %v55_v6  ;;  %v78_v18 = vld [vmem:[#allocation5 + $0x20] sm:$0x7]  ;;  %vm159_vm1 = vcmask 1042432  }
  0x39   :  { %v294_v16 = vpack.c.bf16 %v80_v12, %v79_v11  ;;  %vm423_vm2 = vmmov 0   ;;  %vm155_vm3 = vcmask 285696   ;;  %vm81_vm6 = vcmask 130048   ;;  %s424_s2 = smov [#allocation8]  }
  0x3a   :  { %298 = vmatpush3.bf16.msra.mxu0 %v297_v5  ;;  %vm57_vm0 = vcmp.ge.s32.totalorder %v56_v15, 2  ;;  %290 = vmatprep.mubr.msk.f32.mxu0 %vm423_vm2, %v422_v17  ;;  %s248_s21 = sshll.u32 %s424_s2, 4  ;;  %vm233_vm7 = vcmp.ge.s32.totalorder %v56_v15, 64  ;;  %s249_s21 = int_to_ptr.vmem [resolvable:$true] %s248_s21 }
  0x3b   :  { %299 = vmatprep.subr.bf16.mxu0 %v420_v1  ;;  %295 = vmatpush3.bf16.msra.mxu1 %v294_v16  ;;  %v59_v19 = vsel %vm57_vm0, %v58_v13, 0.0  ;;  %s386_s22 = scalar_lea.vmem %s249_s21, 128  ;;  %p391_p11 = scmp.lt.s32.totalorder %s249_s21, %s249_s21 }
  0x3c   :  { %315 = vset.pattern.permute.xlu0 %v421_v14  ;;  %277 = vmatprep.mubr.msk.f32.mxu1 %vm423_vm2, %v422_v17  ;;  %p387_p10 = scmp.ne.s32.totalorder %s249_s21, %s386_s22  ;;  %p392_p12 = scmp.lt.s32.totalorder %s386_s22, %s386_s22 }
  0x3d   :  { %68 = vperm.xlu0 %315, %v66_v9  }
  0x3e   :  { %301 = vmatpush3.bf16.msra.mxu0 %v300_v10  ;;  %p393_p13 = por %p392_p12, %p391_p11 }
  0x3f   :  { %288 = vmatprep.subr.mxu0 %v422_v17 }
  0x40   :  { %p394_p0 = pnand %p393_p13, %p387_p10 }
  0x42   :  { %289 = vmatpush3.msk.msra.mxu0 %vm159_vm1, %v78_v18 }
  0x43   :  { %291 = vmatmul.mubr.msk.f32.vlgmr.msra.gmra.mrb[0].mxu0 %vm155_vm3, %v59_v19 }
  0xb7   :  { %v62_v20 = vpop.permute.xlu0 %61 }
  0xb8   :  { %vm63_vm4 = vcmp.eq.s32.totalorder %v56_v15, %v62_v20 }
  0xb9   :  { %v258_v22 = vsel %vm63_vm4, 1.0, %v422_v17 }
  0xbc   :  { %v69_v21 = vpop.permute.xlu0 %68 }
  0xbd   :  { %vm70_vm5 = vcmp.eq.s32.totalorder %v56_v15, %v69_v21 }
  0xbe   :  { %v259_v23 = vsel %vm70_vm5, 1.0, %v422_v17 }
  0xbf   :  { %v73_v24 = vadd.f32 %v259_v23, %v258_v22 }
  0xc1   :  { %278 = vmatmul.mubr.msk.f32.vlgmr.msra.gmra.mrb[0].mxu1 %vm81_vm6, %v73_v24 }
 0x116   :  { %v229_v25 = vpop.f32.mrb[0].mxu0 }
 0x117   :  { %v292_v26 = vpop.f32.mrb[1].mxu0 }
 0x194   :  { %v151_v27 = vpop.f32.mrb[0].mxu1 }
 0x195   :  { %v230_v28 = vadd.f32 %v229_v25, %v151_v27  ;;  %v279_v29 = vpop.f32.mrb[1].mxu1 }
 0x197   :  { %v263_v30 = vmul.f32 -1.442695, %v230_v28 }
 0x199   :  { %316 = vpow2.f32 %v263_v30 }
 0x1a3   :  { %v317_v31 = vpop.eup %316 }
 0x1a4   :  { %v237_v32 = vadd.f32 1.0, %v317_v31 }
 0x1a6   :  { %318 = vrcp.f32 %v237_v32 }
 0x1b0   :  { %v319_v33 = vpop.eup %318 }
 0x1b1   :  { %v240_v34 = vsel %vm233_vm7, %v319_v33, %v230_v28 }
 0x1b2   :  { %241 = vst [vmem:[#allocation8] sm:$0xff] %v240_v34 }
 0x1b3   :  { %397 = shalt.err (!%p394_p0)
}
 0x1b4   :  { %s398_s25 = scalar_lea.hbm %s502_s3, 128 }
 0x1b5   :  { %p399_p1 = scmp.ne.s32.totalorder %s502_s3, %s398_s25  ;;  %p402_p2 = scmp.lt.u32.totalorder %s398_s25, %s502_s3 }
 0x1b7   :  { %p404_p3 = pnand %p402_p2, %p399_p1 }
 0x1b9   :  { %407 = shalt.err (!%p404_p3)
}
 0x1ba   :  { %251 = dma.vmem_to_hbm [thread:$0]  %s249_s21, 128, %s502_s3, [#allocation4]  }
 0x1bb   :  { %412 = dma.done.wait [#allocation4], 128  }
 0x1bc   :  { %413 = vsyncadd [#allocation4], 4294967168 }
 0x1bd   :  { %255 = vsyncpa [#allocation3], 1 }
 0x1be   :  { %256 = vsyncpa [#allocation6], 1 }
 0x1bf   :  { %257 = vsyncpa [#allocation4], 1 }

</bundles_post_ra>
